<compile_context>
chip_gen: v7x
topology: tpu7x:2x2x1
jax: 0.10.0
libtpu: 0.0.40
codegen_flags: <defaults>
</compile_context>

<pallas_src>
import jax
import jax.numpy as jnp
from jax.experimental import pallas as pl
from jax.experimental.pallas import tpu as pltpu


def _bnn_kernel(x_ref, w1_ref, b1_ref, wh_ref, bh_ref, out_ref):
    """Fused forward for one batch tile.

    hidden = relu(x @ W1 + b1)            (W1 pre-transposed, H padded to Hp)
    out    = hidden @ W_heads + b_heads   (all heads concatenated, lane-padded)
    """
    x = x_ref[...]                                          # (TM, d_in)
    h = jnp.dot(x, w1_ref[...], preferred_element_type=jnp.float32)
    h = jnp.maximum(h + b1_ref[...], 0.0)                   # bias + ReLU in f32
    acc = jnp.dot(h.astype(wh_ref.dtype), wh_ref[...],
                  preferred_element_type=jnp.float32)
    out_ref[...] = (acc + bh_ref[...]).astype(out_ref.dtype)


def _cdiv(a, b):
    return (a + b - 1) // b


def _round_up(n, m):
    return ((n + m - 1) // m) * m


def _pick_batch_tile(B, sublane, tm_max=1024):
    """Largest batch tile that fits (HBM-bound kernel), split into >= 2 (even)
    grid steps when B allows so v7x's 2 TensorCores can both be used."""
    tm = min(tm_max, _round_up(B, sublane))
    if B > sublane:                                   # can afford >= 2 grid steps
        tm = min(tm, _round_up(_cdiv(B, 2), sublane))
    g = _cdiv(B, tm)
    if g > 1 and g % 2 == 1 and tm > sublane:         # prefer an even step count
        tm_even = _round_up(_cdiv(B, g + 1), sublane)
        if _cdiv(B, tm_even) % 2 == 0:
            tm = tm_even
    return tm


def bayesian_network_forward(x, params, task_outputs, *, use_bf16=False):
    """JAX wrapper mirroring BayesianNetwork.forward(x) (sample flags = False).

    use_bf16=True streams x/weights and stores the padded output in bf16
    (recommended on v6e/v7x); f32 accumulation is preserved.
    """
    B = x.shape[0]
    x_flat = x.reshape(B, -1)
    d_in = x_flat.shape[1]

    w1, b1 = params["l1"]                                   # (H, d_in), (H,)
    H = w1.shape[0]
    Hp = _round_up(H, 128)                                  # lane-dense hidden dim

    # Concatenate every head's (O_t, H) weights / (O_t,) biases.
    head_ws = [params["heads"][task][0] for task, _ in task_outputs]
    head_bs = [params["heads"][task][1] for task, _ in task_outputs]
    w_heads = jnp.concatenate(head_ws, axis=0)              # (sum_o, H)
    b_heads = jnp.concatenate(head_bs, axis=0)              # (sum_o,)
    sum_o = w_heads.shape[0]
    o_pad = _round_up(sum_o, 128)                           # exactly one lane tile here

    mxu_dtype = jnp.bfloat16 if use_bf16 else jnp.float32
    out_dtype = jnp.bfloat16 if use_bf16 else jnp.float32   # bf16 halves writeback bytes
    sublane = 16 if use_bf16 else 8                         # bf16 min tile is (16,128)

    tm = _pick_batch_tile(B, sublane)
    grid = (_cdiv(B, tm),)

    # x: no padded HBM copy.  Ragged last tile reads padding / writes masked rows;
    # rows are independent and the wrapper slice discards them.
    x_p = x_flat.astype(mxu_dtype)

    # Wrapper-side layout work (once, under jit):
    #   W1 -> (d_in, Hp) transposed + zero-padded, biases kept f32,
    #   heads -> (Hp, o_pad) transposed + zero-padded, head bias -> (1, o_pad).
    w1_t = (jnp.zeros((d_in, Hp), jnp.float32)
            .at[:, :H].set(w1.T.astype(jnp.float32))
            .astype(mxu_dtype))                                              # (d_in, Hp)
    b1_r = jnp.zeros((1, Hp), jnp.float32).at[:, :H].set(
        b1.astype(jnp.float32))                                              # (1, Hp)
    wh_t = (jnp.zeros((Hp, o_pad), jnp.float32)
            .at[:H, :sum_o].set(w_heads.T.astype(jnp.float32))
            .astype(mxu_dtype))                                              # (Hp, o_pad)
    bh_r = jnp.zeros((1, o_pad), jnp.float32).at[:, :sum_o].set(
        b_heads.astype(jnp.float32))                                         # (1, o_pad)

    in_itemsize = jnp.dtype(mxu_dtype).itemsize
    out_itemsize = jnp.dtype(out_dtype).itemsize
    flops = 2 * B * (d_in * Hp + Hp * o_pad)
    bytes_accessed = (B * d_in * in_itemsize           # x
                      + d_in * Hp * in_itemsize        # W1
                      + Hp * 4                         # b1
                      + Hp * o_pad * in_itemsize       # head weights
                      + o_pad * 4                      # head bias
                      + B * o_pad * out_itemsize)      # output

    out = pl.pallas_call(
        _bnn_kernel,
        out_shape=jax.ShapeDtypeStruct((B, o_pad), out_dtype),
        grid_spec=pltpu.PrefetchScalarGridSpec(
            num_scalar_prefetch=0,
            grid=grid,
            in_specs=[
                pl.BlockSpec((tm, d_in), lambda i: (i, 0)),    # x tile streams
                pl.BlockSpec((d_in, Hp), lambda i: (0, 0)),    # W1 resident
                pl.BlockSpec((1, Hp), lambda i: (0, 0)),       # b1 resident
                pl.BlockSpec((Hp, o_pad), lambda i: (0, 0)),   # heads resident
                pl.BlockSpec((1, o_pad), lambda i: (0, 0)),    # head bias resident
            ],
            out_specs=pl.BlockSpec((tm, o_pad), lambda i: (i, 0)),
        ),
        compiler_params=pltpu.CompilerParams(
            dimension_semantics=("parallel",),        # shardable across v7x's 2 TCs
            vmem_limit_bytes=32 * 1024 * 1024,        # >> actual ~2-3 MB use; safe on v5e
        ),
        cost_estimate=pl.CostEstimate(
            flops=flops, transcendentals=0, bytes_accessed=bytes_accessed),
    )(x_p, w1_t, b1_r, wh_t, bh_r)

    # Strip lane padding, upcast (if bf16 stores), split back into per-task outputs.
    out = out[:, :sum_o].astype(jnp.float32)
    y = []
    off = 0
    for _, out_size in task_outputs:
        y.append(out[:, off:off + out_size])
        off += out_size
    return y


def _reference_forward(x, params, task_outputs):
    """Pure-JAX reference for correctness checking."""
    B = x.shape[0]
    x_flat = x.reshape(B, -1).astype(jnp.float32)
    w1, b1 = params["l1"]
    h = jnp.maximum(x_flat @ w1.T + b1, 0.0)
    out = []
    for task, _ in task_outputs:
        w_t, b_t = params["heads"][task]
        out.append(h @ w_t.T + b_t)
    return out


def _make_params(key, in_features, hidden_size, task_outputs):
    k_w1, k_b1, k_heads = jax.random.split(key, 3)
    params = {
        "l1": (
            jax.random.normal(k_w1, (hidden_size, in_features), jnp.float32) * 0.1,
            jax.random.normal(k_b1, (hidden_size,), jnp.float32) * 0.1,
        ),
        "heads": [],
    }
    hk = k_heads
    for _, out_size in task_outputs:
        hk, kw, kb = jax.random.split(hk, 3)
        params["heads"].append((
            jax.random.normal(kw, (out_size, hidden_size), jnp.float32) * 0.1,
            jax.random.normal(kb, (out_size,), jnp.float32) * 0.1,
        ))
    return params


if __name__ == "__main__":
    # Small shapes consistent with the module:
    #   args.input_size = (d, size) = (4, 16)  -> in_features = 64
    #   args.hidden_size = 32
    #   args.task_outputs = [(0, 10), (1, 5)]
    #   batch = 2
    d, size = 4, 16
    hidden_size = 32
    batch = 2
    task_outputs = [(0, 10), (1, 5)]
    in_features = d * size

    key = jax.random.PRNGKey(0)
    k_x, k_p = jax.random.split(key, 2)
    params = _make_params(k_p, in_features, hidden_size, task_outputs)

    # --- Test 1: f32 path, small batch (strict numerical check) -----------------
    x = jax.random.normal(k_x, (batch, d, size), jnp.float32)
    y = bayesian_network_forward(x, params, task_outputs, use_bf16=False)
    y = [jax.block_until_ready(yi) for yi in y]
    y_ref = _reference_forward(x, params, task_outputs)
    for yi, yr, (_, out_size) in zip(y, y_ref, task_outputs):
        assert yi.shape == (batch, out_size), yi.shape
        assert jnp.allclose(yi, yr, atol=1e-5, rtol=1e-5), "f32 mismatch vs reference"

    # --- Test 2: f32 path, ragged multi-step grid (exercises no-pad x path) -----
    batch2 = 20
    x2 = jax.random.normal(jax.random.PRNGKey(1), (batch2, d, size), jnp.float32)
    y2 = bayesian_network_forward(x2, params, task_outputs, use_bf16=False)
    y2 = [jax.block_until_ready(yi) for yi in y2]
    y2_ref = _reference_forward(x2, params, task_outputs)
    for yi, yr, (_, out_size) in zip(y2, y2_ref, task_outputs):
        assert yi.shape == (batch2, out_size), yi.shape
        assert jnp.allclose(yi, yr, atol=1e-5, rtol=1e-5), "ragged f32 mismatch"

    # --- Test 3: bf16 streaming/store path (v6e/v7x recommendation), loose tol --
    y3 = bayesian_network_forward(x, params, task_outputs, use_bf16=True)
    y3 = [jax.block_until_ready(yi) for yi in y3]
    for yi, yr, (_, out_size) in zip(y3, y_ref, task_outputs):
        assert yi.shape == (batch, out_size), yi.shape
        assert jnp.allclose(yi, yr, atol=5e-2, rtol=5e-2), "bf16 mismatch vs reference"

    print("KERNEL_OK")
</pallas_src>

<mosaic_0001>
module attributes {stable_mosaic.version = 11 : i64} {
  func.func @_bnn_kernel(%arg0: i32, %arg1: memref<8x64xf32, #tpu.memory_space<vmem>>, %arg2: memref<64x128xf32, #tpu.memory_space<vmem>>, %arg3: memref<1x128xf32, #tpu.memory_space<vmem>>, %arg4: memref<128x128xf32, #tpu.memory_space<vmem>>, %arg5: memref<1x128xf32, #tpu.memory_space<vmem>>, %arg6: memref<8x128xf32, #tpu.memory_space<vmem>>) attributes {dimension_semantics = [#tpu.dimension_semantics<parallel>], iteration_bounds = array<i64: 1>, scalar_prefetch = 0 : i64, scratch_operands = 0 : i64, tpu.core_type = #tpu.core_type<tc>, window_params = [{transform_indices = @transform_0, window_bounds = array<i64: 8, 64>}, {pipeline_mode = #tpu.pipeline_mode<synchronous>, transform_indices = @transform_1, window_bounds = array<i64: 64, 128>}, {pipeline_mode = #tpu.pipeline_mode<synchronous>, transform_indices = @transform_2, window_bounds = array<i64: 1, 128>}, {pipeline_mode = #tpu.pipeline_mode<synchronous>, transform_indices = @transform_3, window_bounds = array<i64: 128, 128>}, {pipeline_mode = #tpu.pipeline_mode<synchronous>, transform_indices = @transform_4, window_bounds = array<i64: 1, 128>}, {transform_indices = @transform_5, window_bounds = array<i64: 8, 128>}]} {
    %c0 = arith.constant 0 : index
    %c0_0 = arith.constant 0 : index
    %0 = vector.load %arg1[%c0, %c0_0] : memref<8x64xf32, #tpu.memory_space<vmem>>, vector<8x64xf32>
    %c0_1 = arith.constant 0 : index
    %c0_2 = arith.constant 0 : index
    %1 = vector.load %arg2[%c0_1, %c0_2] : memref<64x128xf32, #tpu.memory_space<vmem>>, vector<64x128xf32>
    %cst = arith.constant dense<0.000000e+00> : vector<8x128xf32>
    %2 = tpu.matmul %0, %1, %cst {dimension_numbers = #tpu.dot_dimension_numbers<[1], [0], [0], [1], [0, 0, 1, 1], [], []>} : vector<8x64xf32>, vector<64x128xf32>, vector<8x128xf32> -> vector<8x128xf32>
    %c0_3 = arith.constant 0 : index
    %c0_4 = arith.constant 0 : index
    %3 = vector.load %arg3[%c0_3, %c0_4] : memref<1x128xf32, #tpu.memory_space<vmem>>, vector<1x128xf32>
    %4 = vector.broadcast %3 : vector<1x128xf32> to vector<8x128xf32>
    %5 = arith.addf %2, %4 : vector<8x128xf32>
    %cst_5 = arith.constant 0.000000e+00 : f32
    %6 = vector.broadcast %cst_5 : f32 to vector<8x128xf32>
    %7 = arith.maximumf %5, %6 : vector<8x128xf32>
    %c0_6 = arith.constant 0 : index
    %c0_7 = arith.constant 0 : index
    %8 = vector.load %arg4[%c0_6, %c0_7] : memref<128x128xf32, #tpu.memory_space<vmem>>, vector<128x128xf32>
    %cst_8 = arith.constant dense<0.000000e+00> : vector<8x128xf32>
    %9 = tpu.matmul %7, %8, %cst_8 {dimension_numbers = #tpu.dot_dimension_numbers<[1], [0], [0], [1], [0, 0, 1, 1], [], []>} : vector<8x128xf32>, vector<128x128xf32>, vector<8x128xf32> -> vector<8x128xf32>
    %c0_9 = arith.constant 0 : index
    %c0_10 = arith.constant 0 : index
    %10 = vector.load %arg5[%c0_9, %c0_10] : memref<1x128xf32, #tpu.memory_space<vmem>>, vector<1x128xf32>
    %11 = vector.broadcast %10 : vector<1x128xf32> to vector<8x128xf32>
    %12 = arith.addf %9, %11 : vector<8x128xf32>
    %c0_11 = arith.constant 0 : index
    %c0_12 = arith.constant 0 : index
    %13 = vector.load %arg6[%c0_11, %c0_12] : memref<8x128xf32, #tpu.memory_space<vmem>>, vector<8x128xf32>
    tpu.vector_store %arg6[%c0_11, %c0_12], %12 {strides = array<i32>} : memref<8x128xf32, #tpu.memory_space<vmem>>, vector<8x128xf32>,
    return
  }
  func.func @transform_0(%arg0: i32) -> (i32, i32) {
    %c0_i32 = arith.constant 0 : i32
    %c0_i32_0 = arith.constant 0 : i32
    return %arg0, %c0_i32 : i32, i32
  }
  func.func @transform_1(%arg0: i32) -> (i32, i32) {
    %c0_i32 = arith.constant 0 : i32
    %c0_i32_0 = arith.constant 0 : i32
    %c0_i32_1 = arith.constant 0 : i32
    return %c0_i32, %c0_i32_0 : i32, i32
  }
  func.func @transform_2(%arg0: i32) -> (i32, i32) {
    %c0_i32 = arith.constant 0 : i32
    %c0_i32_0 = arith.constant 0 : i32
    %c0_i32_1 = arith.constant 0 : i32
    return %c0_i32, %c0_i32_0 : i32, i32
  }
  func.func @transform_3(%arg0: i32) -> (i32, i32) {
    %c0_i32 = arith.constant 0 : i32
    %c0_i32_0 = arith.constant 0 : i32
    %c0_i32_1 = arith.constant 0 : i32
    return %c0_i32, %c0_i32_0 : i32, i32
  }
  func.func @transform_4(%arg0: i32) -> (i32, i32) {
    %c0_i32 = arith.constant 0 : i32
    %c0_i32_0 = arith.constant 0 : i32
    %c0_i32_1 = arith.constant 0 : i32
    return %c0_i32, %c0_i32_0 : i32, i32
  }
  func.func @transform_5(%arg0: i32) -> (i32, i32) {
    %c0_i32 = arith.constant 0 : i32
    %c0_i32_0 = arith.constant 0 : i32
    return %arg0, %c0_i32 : i32, i32
  }
}

</mosaic_0001>

<bundles_post_ra>
// kernel: tpu_custom_call.1
= control target key start
LH: loop header
LB: loop body
LE: loop exit
PB: predicated region body
PF: predicated region fallthrough
CT: control target
= control target key end

     0   :  { %10 = vsyncpa [#allocation3], 0  ;;  %s596_s0 = inlined_call_operand.hbm [shape: f32[2,64], index: 0, kind: input, shape index: {}]   ;;  %s597_s1 = inlined_call_operand.hbm [shape: f32[64,128], index: 1, kind: input, shape index: {}]   ;;  %s598_s2 = inlined_call_operand.vmem [shape: f32[1,128], index: 2, kind: input, shape index: {}]   ;;  %s599_s3 = inlined_call_operand.hbm [shape: f32[128,128], index: 3, kind: input, shape index: {}]   ;;  %s600_s4 = inlined_call_operand.vmem [shape: f32[1,128], index: 4, kind: input, shape index: {}]   ;;  %s601_s5 = inlined_call_operand.hbm [shape: f32[2,128], index: 5, kind: output, shape index: {}]  }
   0x1   :  { %11 = vsyncpa [#allocation6], 0 }
   0x2   :  { %12 = vsyncpa [#allocation4], 0 }
   0x3   :  { %17 = vsyncadd [#allocation3], 96  ;;  %s489_s18 = smov [#allocation5]   ;;  %s395_s22 = scalar_lea.hbm %s597_s1, 1024 }
   0x4   :  { %s30_s19 = sshll.u32 %s489_s18, 4  ;;  %p396_p0 = scmp.ne.s32.totalorder %s597_s1, %s395_s22  ;;  %s31_s19 = int_to_ptr.vmem [resolvable:$true] %s30_s19 }
   0x5   :  { %p399_p1 = scmp.lt.u32.totalorder %s395_s22, %s597_s1 }
   0x7   :  { %p401_p2 = pnand %p399_p1, %p396_p0 }
   0x9   :  { %404 = shalt.err (!%p401_p2)
}
   0xa   :  { %s405_s27 = scalar_lea.vmem %s31_s19, 1024  ;;  %p410_p4 = scmp.lt.s32.totalorder %s31_s19, %s31_s19 }
   0xb   :  { %p406_p3 = scmp.ne.s32.totalorder %s31_s19, %s405_s27  ;;  %p411_p5 = scmp.lt.s32.totalorder %s405_s27, %s405_s27 }
   0xd   :  { %p412_p6 = por %p411_p5, %p410_p4 }
   0xf   :  { %p413_p7 = pnand %p412_p6, %p406_p3 }
  0x11   :  { %416 = shalt.err (!%p413_p7)
}
  0x12   :  { %s490_s28 = smov 128   ;;  %s491_s29 = smov 8  }
  0x13   :  { %36 = dma.hbm_to_vmem [thread:$0]  %s597_s1, 1024, %s31_s19, [#allocation6], %s490_s28, %s490_s28, %s491_s29  }
  0x14   :  { %s492_s7 = smov [#allocation2]   ;;  %s417_s11 = scalar_lea.hbm %s596_s0, 32 }
  0x15   :  { %s18_s8 = sshll.u32 %s492_s7, 4  ;;  %p418_p8 = scmp.ne.s32.totalorder %s596_s0, %s417_s11  ;;  %s19_s8 = int_to_ptr.vmem [resolvable:$true] %s18_s8 }
  0x16   :  { %p421_p9 = scmp.lt.u32.totalorder %s417_s11, %s596_s0 }
  0x18   :  { %p423_p10 = pnand %p421_p9, %p418_p8 }
  0x1a   :  { %426 = shalt.err (!%p423_p10)
}
  0x1b   :  { %s427_s16 = scalar_lea.vmem %s19_s8, 32  ;;  %s431_s1 = scalar_lea.vmem %s19_s8, 128 }
  0x1c   :  { %p428_p11 = scmp.ne.s32.totalorder %s19_s8, %s427_s16  ;;  %p432_p12 = scmp.lt.s32.totalorder %s19_s8, %s19_s8 }
  0x1d   :  { %p433_p13 = scmp.lt.s32.totalorder %s431_s1, %s427_s16 }
  0x1f   :  { %p434_p0 = por %p433_p13, %p432_p12 }
  0x21   :  { %p435_p1 = pnand %p434_p0, %p428_p11 }
  0x23   :  { %438 = shalt.err (!%p435_p1)
}
  0x24   :  { %s493_s17 = smov 32   ;;  %s494_s18 = smov 2  }
  0x25   :  { %24 = dma.hbm_to_vmem [thread:$0]  %s596_s0, 32, %s19_s8, [#allocation3], %s493_s17, %s493_s17, %s494_s18  }
  0x26   :  { %s495_s21 = smov [#allocation7]   ;;  %s439_s25 = scalar_lea.hbm %s599_s3, 2048 }
  0x27   :  { %s44_s22 = sshll.u32 %s495_s21, 4  ;;  %p440_p2 = scmp.ne.s32.totalorder %s599_s3, %s439_s25  ;;  %s45_s22 = int_to_ptr.vmem [resolvable:$true] %s44_s22 }
  0x28   :  { %p443_p3 = scmp.lt.u32.totalorder %s439_s25, %s599_s3 }
  0x2a   :  { %p445_p4 = pnand %p443_p3, %p440_p2 }
  0x2c   :  { %448 = shalt.err (!%p445_p4)
}
  0x2d   :  { %s449_s7 = scalar_lea.vmem %s45_s22, 2048  ;;  %p454_p6 = scmp.lt.s32.totalorder %s45_s22, %s45_s22 }
  0x2e   :  { %p450_p5 = scmp.ne.s32.totalorder %s45_s22, %s449_s7  ;;  %p455_p7 = scmp.lt.s32.totalorder %s449_s7, %s449_s7 }
  0x30   :  { %p456_p8 = por %p455_p7, %p454_p6 }
  0x32   :  { %p457_p9 = pnand %p456_p8, %p450_p5 }
  0x34   :  { %460 = shalt.err (!%p457_p9)
}
  0x35   :  { %50 = dma.hbm_to_vmem [thread:$0]  %s599_s3, 2048, %s45_s22, [#allocation6], %s490_s28, %s490_s28, %s491_s29  }
  0x36   :  { %483 = dma.done.wait [#allocation3], 128  }
  0x37   :  { %484 = vsyncadd [#allocation3], 4294967168 }
  0x38   :  { %485 = dma.done.wait [#allocation6], 3072  }
  0x39   :  { %486 = vsyncadd [#allocation6], 4294964224  ;;  %v496_v0 = vmov 0.0|0.0   ;;  %vm497_vm0 = vmmov 0   ;;  %v498_v1 = vmov 0.0   ;;  %v63_v2 = vld [vmem:[#allocation5] sm:$0xff] }
  0x3a   :  { %348 = vmatprep.subr.bf16.mxu0 %v496_v0  ;;  %310 = vmatprep.mubr.msk.f32.mxu0 %vm497_vm0, %v498_v1  ;;  %v64_v3 = vld [vmem:[#allocation5 + $0x8] sm:$0xff]  ;;  %v65_v4 = vld [vmem:[#allocation5 + $0x10] sm:$0xff]  ;;  %v66_v6 = vld [vmem:[#allocation5 + $0x18] sm:$0xff]  ;;  %vm78_vm1 = vcmask 523264  }
  0x3b   :  { %360 = vmatprep.subr.bf16.mxu1 %v496_v0  ;;  %345 = vmatprep.mubr.msk.f32.mxu1 %vm497_vm0, %v498_v1  ;;  %v349_v5 = vpack.c.bf16 %v64_v3, %v63_v2  ;;  %v352_v7 = vpack.c.bf16 %v66_v6, %v65_v4  ;;  %v153_v8 = vld [vmem:[#allocation7] sm:$0xff]  ;;  %v154_v9 = vld [vmem:[#allocation7 + $0x8] sm:$0xff]  ;;  %v155_v10 = vld [vmem:[#allocation7 + $0x10] sm:$0xff] }
  0x3c   :  { %v67_v11 = vld [vmem:[#allocation5 + $0x20] sm:$0xff]  ;;  %v68_v12 = vld [vmem:[#allocation5 + $0x28] sm:$0xff]  ;;  %v361_v13 = vpack.c.bf16 %v154_v9, %v153_v8  ;;  %v156_v14 = vld [vmem:[#allocation7 + $0x18] sm:$0xff] }
  0x3d   :  { %350 = vmatpush3.bf16.msra.mxu0 %v349_v5  ;;  %v364_v15 = vpack.c.bf16 %v156_v14, %v155_v10  ;;  %v355_v16 = vpack.c.bf16 %v68_v12, %v67_v11  ;;  %v157_v17 = vld [vmem:[#allocation7 + $0x20] sm:$0xff]  ;;  %v158_v18 = vld [vmem:[#allocation7 + $0x28] sm:$0xff]  ;;  %v69_v19 = vld [vmem:[#allocation5 + $0x30] sm:$0xff] }
  0x3e   :  { %351 = vmatprep.subr.bf16.mxu0 %v496_v0  ;;  %362 = vmatpush3.bf16.msra.mxu1 %v361_v13  ;;  %v70_v20 = vld [vmem:[#allocation5 + $0x38] sm:$0xff]  ;;  %v367_v21 = vpack.c.bf16 %v158_v18, %v157_v17  ;;  %v159_v23 = vld [vmem:[#allocation7 + $0x30] sm:$0xff]  ;;  %v161_v27 = vld [vmem:[#allocation7 + $0x40] sm:$0xff] }
  0x3f   :  { %363 = vmatprep.subr.bf16.mxu1 %v496_v0  ;;  %v358_v22 = vpack.c.bf16 %v70_v20, %v69_v19  ;;  %v160_v24 = vld [vmem:[#allocation7 + $0x38] sm:$0xff]  ;;  %v162_v28 = vld [vmem:[#allocation7 + $0x48] sm:$0xff]  ;;  %v163_v30 = vld [vmem:[#allocation7 + $0x50] sm:$0xff] }
  0x40   :  { %v370_v25 = vpack.c.bf16 %v160_v24, %v159_v23  ;;  %v62_v26 = vld [vmem:[#allocation2] sm:$0xff]  ;;  %v373_v29 = vpack.c.bf16 %v162_v28, %v161_v27  ;;  %v165_v33 = vld [vmem:[#allocation7 + $0x60] sm:$0xff]  ;;  %v166_v34 = vld [vmem:[#allocation7 + $0x68] sm:$0xff] }
  0x41   :  { %353 = vmatpush3.bf16.msra.mxu0 %v352_v7  ;;  %v164_v31 = vld [vmem:[#allocation7 + $0x58] sm:$0xff]  ;;  %v379_v35 = vpack.c.bf16 %v166_v34, %v165_v33  ;;  %v167_v36 = vld [vmem:[#allocation7 + $0x70] sm:$0xff] }
  0x42   :  { %354 = vmatprep.subr.bf16.mxu0 %v496_v0  ;;  %365 = vmatpush3.bf16.msra.mxu1 %v364_v15  ;;  %v376_v32 = vpack.c.bf16 %v164_v31, %v163_v30  ;;  %v168_v37 = vld [vmem:[#allocation7 + $0x78] sm:$0xff] }
  0x43   :  { %366 = vmatprep.subr.bf16.mxu1 %v496_v0  ;;  %v382_v38 = vpack.c.bf16 %v168_v37, %v167_v36  ;;  %v265_v39 = vld [vmem:[%s598_s2] ss:$0 sm:$0xff] }
  0x44   :  { %v267_v44 = vld [vmem:[%s600_s4] ss:$0 sm:$0xff] }
  0x45   :  { %356 = vmatpush3.bf16.msra.mxu0 %v355_v16 }
  0x46   :  { %357 = vmatprep.subr.bf16.mxu0 %v496_v0  ;;  %368 = vmatpush3.bf16.msra.mxu1 %v367_v21 }
  0x47   :  { %369 = vmatprep.subr.bf16.mxu1 %v496_v0 }
  0x49   :  { %359 = vmatpush3.bf16.msra.mxu0 %v358_v22 }
  0x4a   :  { %371 = vmatpush3.bf16.msra.mxu1 %v370_v25 }
  0x4b   :  { %372 = vmatprep.subr.bf16.mxu1 %v496_v0 }
  0x4c   :  { %311 = vmatmul.mubr.msk.f32.vlgmr.msra.gmra.mrb[0].mxu0 %vm78_vm1, %v62_v26 }
  0x4e   :  { %374 = vmatpush3.bf16.msra.mxu1 %v373_v29 }
  0x4f   :  { %375 = vmatprep.subr.bf16.mxu1 %v496_v0 }
  0x52   :  { %377 = vmatpush3.bf16.msra.mxu1 %v376_v32 }
  0x53   :  { %378 = vmatprep.subr.bf16.mxu1 %v496_v0 }
  0x56   :  { %380 = vmatpush3.bf16.msra.mxu1 %v379_v35 }
  0x57   :  { %381 = vmatprep.subr.bf16.mxu1 %v496_v0 }
  0x5a   :  { %383 = vmatpush3.bf16.msra.mxu1 %v382_v38 }
 0x11f   :  { %v148_v40 = vpop.f32.mrb[0].mxu0 }
 0x120   :  { %v149_v41 = vadd.f32 %v265_v39, %v148_v40  ;;  %v312_v42 = vpop.f32.mrb[1].mxu0 }
 0x122   :  { %v152_v43 = vmax.f32 %v149_v41, 0.0 }
 0x124   :  { %346 = vmatmul.mubr.f32.vlgmr.msra.gmra.mrb[0].mxu1 %v152_v43 }
 0x1f7   :  { %v242_v45 = vpop.f32.mrb[0].mxu1 }
 0x1f8   :  { %v243_v46 = vadd.f32 %v267_v44, %v242_v45  ;;  %v347_v47 = vpop.f32.mrb[1].mxu1 }
 0x1fa   :  { %246 = vst [vmem:[#allocation8] sm:$0xff] %v243_v46 }
 0x1fb   :  { %251 = vsyncadd [#allocation4], 96  ;;  %s499_s10 = smov [#allocation8]  }
 0x1fc   :  { %s252_s11 = sshll.u32 %s499_s10, 4  ;;  %s253_s11 = int_to_ptr.vmem [resolvable:$true] %s252_s11 }
 0x1fd   :  { %s461_s12 = scalar_lea.vmem %s253_s11, 32  ;;  %s465_s2 = scalar_lea.vmem %s253_s11, 128 }
 0x1fe   :  { %p462_p10 = scmp.ne.s32.totalorder %s253_s11, %s461_s12  ;;  %p466_p11 = scmp.lt.s32.totalorder %s253_s11, %s253_s11 }
 0x1ff   :  { %p467_p12 = scmp.lt.s32.totalorder %s465_s2, %s461_s12 }
 0x201   :  { %p468_p13 = por %p467_p12, %p466_p11 }
 0x203   :  { %p469_p0 = pnand %p468_p13, %p462_p10 }
 0x205   :  { %472 = shalt.err (!%p469_p0)
}
 0x206   :  { %s473_s4 = scalar_lea.hbm %s601_s5, 32 }
 0x207   :  { %p474_p1 = scmp.ne.s32.totalorder %s601_s5, %s473_s4  ;;  %p477_p2 = scmp.lt.u32.totalorder %s473_s4, %s601_s5 }
 0x209   :  { %p479_p3 = pnand %p477_p2, %p474_p1 }
 0x20b   :  { %482 = shalt.err (!%p479_p3)
}
 0x20c   :  { %258 = dma.vmem_to_hbm [thread:$0]  %s253_s11, 32, %s601_s5, [#allocation4], %s493_s17, %s493_s17, %s494_s18  }
 0x20d   :  { %487 = dma.done.wait [#allocation4], 128  }
 0x20e   :  { %488 = vsyncadd [#allocation4], 4294967168 }
 0x20f   :  { %262 = vsyncpa [#allocation3], 1 }
 0x210   :  { %263 = vsyncpa [#allocation6], 1 }
 0x211   :  { %264 = vsyncpa [#allocation4], 1 }

</bundles_post_ra>
